<compile_context>
chip_gen: v7x
topology: tpu7x:2x2x1
jax: 0.10.0
libtpu: 0.0.40
codegen_flags: <defaults>
</compile_context>

<pallas_src>
import functools

import jax
import jax.numpy as jnp
from jax import lax
from jax.experimental import pallas as pl
from jax.experimental.pallas import tpu as pltpu


def _clip_embedding_kernel(ids_ref, table_ref, pos_ref, out_ref, sem_ref,
                           *, tb, seq, ring):
    # ids_ref  : SMEM (B*S,) int32   token ids (scalar-prefetched)
    # table_ref: HBM  (V, D)         embedding table (memory_space=pl.ANY)
    # pos_ref  : VMEM (S, D)         positional embedding (resident, const index)
    # out_ref  : VMEM (tb, S, D)     output tile for batch-tile `i`
    # sem_ref  : DMA semaphores (ring,)
    i = pl.program_id(0)
    n0 = i * (tb * seq)                       # first flat row of this tile

    def row_copy(row_id, t, s, slot):
        # (1, D) HBM row  ->  (1, D) row of the output block (no scratch pass).
        return pltpu.make_async_copy(
            table_ref.at[pl.ds(row_id, 1)],
            out_ref.at[t, pl.ds(s, 1)],
            sem_ref.at[slot],
        )

    def wait_slot(slot):
        # Reconstruct an equal-sized descriptor just to wait (paged-attn style).
        pltpu.make_async_copy(
            table_ref.at[pl.ds(0, 1)],
            out_ref.at[0, pl.ds(0, 1)],
            sem_ref.at[slot],
        ).wait()

    # ---- gather: continuous bounded ring of row DMAs with duplicate-token
    #      skipping.  `count` = number of DMAs actually issued so far. ----
    def make_body(t):
        def body(s, count):
            g = n0 + t * seq + s
            # Read ids from SMEM BEFORE any semaphore wait.
            row = ids_ref[g]
            prev = ids_ref[jnp.maximum(g - 1, 0)]
            is_dup = jnp.logical_and(s > 0, row == prev)   # within-sequence only
            do_copy = jnp.logical_not(is_dup)
            slot = count % ring

            @pl.when(jnp.logical_and(do_copy, count >= ring))
            def _():
                wait_slot(slot)                # recycle the ring slot

            @pl.when(do_copy)
            def _():
                row_copy(row, t, s, slot).start()

            return count + jnp.where(is_dup, 0, 1)
        return body

    count = jnp.int32(0)
    for t in range(tb):                        # static, small (<= 4)
        count = lax.fori_loop(0, seq, make_body(t), count)

    # ---- drain: wait for every still-outstanding row copy ----
    @pl.loop(0, ring)
    def _(k):
        @pl.when(k < count)
        def _():
            wait_slot(k)

    # ---- fill deduped rows from their predecessor (ascending s => chains ok,
    #      raw embedding rows, before the positional add) ----
    for t in range(tb):
        out_t = out_ref.at[t]
        @pl.loop(1, seq)
        def _(s):
            g = n0 + t * seq + s
            @pl.when(ids_ref[g] == ids_ref[g - 1])
            def _():
                out_t[pl.ds(s, 1), :] = out_t[pl.ds(s - 1, 1), :]

    # ---- one dense, lane/sublane-dense positional add over the whole tile ----
    out_ref[...] = out_ref[...] + pos_ref[...]


def _pick_batch_tile(batch, max_tb=4):
    """Largest tile <= max_tb dividing batch; prefer >= 2 grid steps (megacore)."""
    if batch <= 1:
        return 1
    upper = max(1, min(max_tb, batch // 2))
    for t in range(upper, 0, -1):
        if batch % t == 0:
            return t
    return 1


def clip_embedding(ids, table, pos_embd, *, batch_tile=None, ring=32):
    B, S = ids.shape
    V, D = table.shape
    assert pos_embd.shape == (S, D)
    # Avoid silently discarding positional-embedding precision (review note).
    assert pos_embd.dtype == table.dtype, (pos_embd.dtype, table.dtype)

    tb = _pick_batch_tile(B) if batch_tile is None else batch_tile
    assert B % tb == 0
    ring = max(1, min(ring, tb * S))

    # Flatten ids to 1-D for scalar prefetch (avoids 2-D SMEM lane padding).
    ids_flat = ids.reshape(B * S).astype(jnp.int32)

    kernel = functools.partial(_clip_embedding_kernel, tb=tb, seq=S, ring=ring)

    grid_spec = pltpu.PrefetchScalarGridSpec(
        num_scalar_prefetch=1,                 # ids -> SMEM
        grid=(B // tb,),
        in_specs=[
            # Embedding table: stays in HBM; gathered manually in the kernel.
            pl.BlockSpec(memory_space=pl.ANY),
            # Positional embedding: full array, constant block index ->
            # DMA'd once and kept VMEM-resident.
            pl.BlockSpec((S, D), lambda i, ids: (0, 0)),
        ],
        out_specs=pl.BlockSpec((tb, S, D), lambda i, ids: (i, 0, 0)),
        scratch_shapes=[
            pltpu.SemaphoreType.DMA((ring,)),  # gather DMA ring
        ],
    )

    return pl.pallas_call(
        kernel,
        out_shape=jax.ShapeDtypeStruct((B, S, D), table.dtype),
        grid_spec=grid_spec,
        compiler_params=pltpu.CompilerParams(
            dimension_semantics=("parallel",),  # v7x: batch tiles shard over 2 TCs
        ),
    )(ids_flat, table, pos_embd)


if __name__ == "__main__":
    # Small stand-ins for Args(vocab_size=49408, seq_len=77, d_model=768).
    B, S, D, V = 2, 8, 128, 512

    key = jax.random.PRNGKey(0)
    k_ids, k_tab, k_pos = jax.random.split(key, 3)

    ids = jax.random.randint(k_ids, (B, S), 0, V, dtype=jnp.int32)
    # Emulate CLIP-style padding (runs of identical token ids) so the
    # duplicate-token dedup / fill path is actually exercised.
    ids = ids.at[:, S // 2:].set(0)

    # nn.Embedding default init ~ N(0, 1)
    table = jax.random.normal(k_tab, (V, D), dtype=jnp.float32)
    # Module inits pos_embd to zeros; use small random values so the add path
    # is exercised.
    pos_embd = 0.02 * jax.random.normal(k_pos, (S, D), dtype=jnp.float32)

    out = jax.block_until_ready(clip_embedding(ids, table, pos_embd))

    # Pure-JAX reference for the forward semantics.
    ref = table[ids] + pos_embd[None, :, :]
    assert out.shape == (B, S, D) and out.dtype == jnp.float32
    assert jnp.allclose(out, ref, atol=1e-6, rtol=1e-6)
    print("KERNEL_OK")
</pallas_src>

<mosaic_0001>
module attributes {stable_mosaic.version = 11 : i64} {
  func.func @_clip_embedding_kernel(%arg0: i32, %arg1: memref<16xi32, #tpu.memory_space<smem>>, %arg2: memref<512x128xf32, #tpu.memory_space<any>>, %arg3: memref<8x128xf32, #tpu.memory_space<vmem>>, %arg4: memref<1x8x128xf32, #tpu.memory_space<vmem>>, %arg5: memref<8x!tpu.dma_semaphore, #tpu.memory_space<semaphore_mem>>) attributes {dimension_semantics = [#tpu.dimension_semantics<parallel>], iteration_bounds = array<i64: 2>, scalar_prefetch = 1 : i64, scratch_operands = 1 : i64, tpu.core_type = #tpu.core_type<tc>, window_params = [{}, {pipeline_mode = #tpu.pipeline_mode<synchronous>, transform_indices = @transform_1, window_bounds = array<i64: 8, 128>}, {transform_indices = @transform_2, window_bounds = array<i64: 1, 8, 128>}]} {
    %c8_i32 = arith.constant 8 : i32
    %0 = arith.muli %arg0, %c8_i32 : i32
    %c0_i32 = arith.constant 0 : i32
    %c0_i32_0 = arith.constant 0 : i32
    %c8_i32_1 = arith.constant 8 : i32
    %1 = arith.addi %c0_i32_0, %c8_i32_1 : i32
    %c1_i32 = arith.constant 1 : i32
    %2 = scf.for %arg6 = %c0_i32_0 to %1 step %c1_i32 iter_args(%arg7 = %c0_i32) -> (i32)  : i32 {
      %c0_i32_18 = arith.constant 0 : i32
      %10 = arith.addi %0, %c0_i32_18 : i32
      %11 = arith.addi %10, %arg6 : i32
      %12 = arith.index_cast %11 : i32 to index
      %13 = memref.load %arg1[%12] : memref<16xi32, #tpu.memory_space<smem>>
      %c1_i32_19 = arith.constant 1 : i32
      %14 = arith.subi %11, %c1_i32_19 : i32
      %c0_i32_20 = arith.constant 0 : i32
      %15 = arith.maxsi %14, %c0_i32_20 : i32
      %16 = arith.index_cast %15 : i32 to index
      %17 = memref.load %arg1[%16] : memref<16xi32, #tpu.memory_space<smem>>
      %c0_i32_21 = arith.constant 0 : i32
      %18 = arith.cmpi sgt, %arg6, %c0_i32_21 : i32
      %19 = arith.cmpi eq, %13, %17 : i32
      %20 = arith.andi %18, %19 : i1
      %true = arith.constant true
      %21 = arith.xori %20, %true : i1
      %c8_i32_22 = arith.constant 8 : i32
      %c0_i32_23 = arith.constant 0 : i32
      %22 = arith.cmpi eq, %c8_i32_22, %c0_i32_23 : i32
      %c1_i32_24 = arith.constant 1 : i32
      %23 = arith.select %22, %c1_i32_24, %c8_i32_22 : i32
      %24 = arith.remsi %arg7, %23 : i32
      %c0_i32_25 = arith.constant 0 : i32
      %25 = arith.cmpi ne, %24, %c0_i32_25 : i32
      %c0_i32_26 = arith.constant 0 : i32
      %26 = arith.cmpi slt, %24, %c0_i32_26 : i32
      %c0_i32_27 = arith.constant 0 : i32
      %27 = arith.cmpi slt, %23, %c0_i32_27 : i32
      %28 = arith.xori %26, %27 : i1
      %29 = arith.andi %28, %25 : i1
      %30 = arith.addi %24, %23 : i32
      %31 = arith.select %29, %30, %24 : i32
      %c8_i32_28 = arith.constant 8 : i32
      %32 = arith.cmpi sge, %arg7, %c8_i32_28 : i32
      %33 = arith.andi %21, %32 : i1
      %34 = arith.extui %33 : i1 to i32
      %c0_i32_29 = arith.constant 0 : i32
      %35 = arith.cmpi ne, %34, %c0_i32_29 : i32
      scf.if %35 {
        %c0_i32_33 = arith.constant 0 : i32
        %c0_i32_34 = arith.constant 0 : i32
        %c0_i32_35 = arith.constant 0 : i32
        %40 = tpu.memref_slice %arg2[%c0_i32_34, %c0_i32_35] : memref<512x128xf32, #tpu.memory_space<any>> -> memref<1x128xf32, #tpu.memory_space<any>>
        %c0_i32_36 = arith.constant 0 : i32
        %c0_i32_37 = arith.constant 0 : i32
        %41 = tpu.memref_slice %arg4[%c0_i32_33, %c0_i32_36, %c0_i32_37] : memref<1x8x128xf32, #tpu.memory_space<vmem>> -> memref<1x1x128xf32, #tpu.memory_space<vmem>>
        %42 = tpu.memref_squeeze %41 : memref<1x1x128xf32, #tpu.memory_space<vmem>> -> memref<1x128xf32, #tpu.memory_space<vmem>>
        %43 = tpu.memref_slice %arg5[%31] : memref<8x!tpu.dma_semaphore, #tpu.memory_space<semaphore_mem>> -> memref<1x!tpu.dma_semaphore, #tpu.memory_space<semaphore_mem>>
        %44 = tpu.memref_squeeze %43 : memref<1x!tpu.dma_semaphore, #tpu.memory_space<semaphore_mem>> -> memref<!tpu.dma_semaphore, #tpu.memory_space<semaphore_mem>>
        tpu.wait_dma2 semaphore(%44 : memref<!tpu.dma_semaphore, #tpu.memory_space<semaphore_mem>>) src(%40 : memref<1x128xf32, #tpu.memory_space<any>>) dst(%42 : memref<1x128xf32, #tpu.memory_space<vmem>>)
      } else {
      }
      %36 = arith.extui %21 : i1 to i32
      %c0_i32_30 = arith.constant 0 : i32
      %37 = arith.cmpi ne, %36, %c0_i32_30 : i32
      scf.if %37 {
        %c0_i32_33 = arith.constant 0 : i32
        %c0_i32_34 = arith.constant 0 : i32
        %40 = tpu.memref_slice %arg2[%13, %c0_i32_34] : memref<512x128xf32, #tpu.memory_space<any>> -> memref<1x128xf32, #tpu.memory_space<any>>
        %c0_i32_35 = arith.constant 0 : i32
        %41 = tpu.memref_slice %arg4[%c0_i32_33, %arg6, %c0_i32_35] : memref<1x8x128xf32, #tpu.memory_space<vmem>> -> memref<1x1x128xf32, #tpu.memory_space<vmem>>
        %42 = tpu.memref_squeeze %41 : memref<1x1x128xf32, #tpu.memory_space<vmem>> -> memref<1x128xf32, #tpu.memory_space<vmem>>
        %43 = tpu.memref_slice %arg5[%31] : memref<8x!tpu.dma_semaphore, #tpu.memory_space<semaphore_mem>> -> memref<1x!tpu.dma_semaphore, #tpu.memory_space<semaphore_mem>>
        %44 = tpu.memref_squeeze %43 : memref<1x!tpu.dma_semaphore, #tpu.memory_space<semaphore_mem>> -> memref<!tpu.dma_semaphore, #tpu.memory_space<semaphore_mem>>
        tpu.enqueue_dma source(%40 : memref<1x128xf32, #tpu.memory_space<any>>) target(%42 : memref<1x128xf32, #tpu.memory_space<vmem>>) target_semaphore(%44 : memref<!tpu.dma_semaphore, #tpu.memory_space<semaphore_mem>>)
      } else {
      }
      %c0_i32_31 = arith.constant 0 : i32
      %c1_i32_32 = arith.constant 1 : i32
      %38 = arith.select %20, %c0_i32_31, %c1_i32_32 : i32
      %39 = arith.addi %arg7, %38 : i32
      scf.yield %39 : i32
    }
    %c8_i32_2 = arith.constant 8 : i32
    %c0_i32_3 = arith.constant 0 : i32
    %c8_i32_4 = arith.constant 8 : i32
    %3 = arith.addi %c0_i32_3, %c8_i32_4 : i32
    %c1_i32_5 = arith.constant 1 : i32
    scf.for %arg6 = %c0_i32_3 to %3 step %c1_i32_5  : i32 {
      %c1_i32_18 = arith.constant 1 : i32
      %10 = arith.muli %arg6, %c1_i32_18 : i32
      %c0_i32_19 = arith.constant 0 : i32
      %11 = arith.addi %c0_i32_19, %10 : i32
      %12 = arith.cmpi slt, %11, %2 : i32
      %13 = arith.extui %12 : i1 to i32
      %c0_i32_20 = arith.constant 0 : i32
      %14 = arith.cmpi ne, %13, %c0_i32_20 : i32
      scf.if %14 {
        %c0_i32_21 = arith.constant 0 : i32
        %c0_i32_22 = arith.constant 0 : i32
        %c0_i32_23 = arith.constant 0 : i32
        %15 = tpu.memref_slice %arg2[%c0_i32_22, %c0_i32_23] : memref<512x128xf32, #tpu.memory_space<any>> -> memref<1x128xf32, #tpu.memory_space<any>>
        %c0_i32_24 = arith.constant 0 : i32
        %c0_i32_25 = arith.constant 0 : i32
        %16 = tpu.memref_slice %arg4[%c0_i32_21, %c0_i32_24, %c0_i32_25] : memref<1x8x128xf32, #tpu.memory_space<vmem>> -> memref<1x1x128xf32, #tpu.memory_space<vmem>>
        %17 = tpu.memref_squeeze %16 : memref<1x1x128xf32, #tpu.memory_space<vmem>> -> memref<1x128xf32, #tpu.memory_space<vmem>>
        %18 = tpu.memref_slice %arg5[%11] : memref<8x!tpu.dma_semaphore, #tpu.memory_space<semaphore_mem>> -> memref<1x!tpu.dma_semaphore, #tpu.memory_space<semaphore_mem>>
        %19 = tpu.memref_squeeze %18 : memref<1x!tpu.dma_semaphore, #tpu.memory_space<semaphore_mem>> -> memref<!tpu.dma_semaphore, #tpu.memory_space<semaphore_mem>>
        tpu.wait_dma2 semaphore(%19 : memref<!tpu.dma_semaphore, #tpu.memory_space<semaphore_mem>>) src(%15 : memref<1x128xf32, #tpu.memory_space<any>>) dst(%17 : memref<1x128xf32, #tpu.memory_space<vmem>>)
      } else {
      }
    }
    %c8_i32_6 = arith.constant 8 : i32
    %c0_i32_7 = arith.constant 0 : i32
    %c0_i32_8 = arith.constant 0 : i32
    %c7_i32 = arith.constant 7 : i32
    %4 = arith.addi %c0_i32_8, %c7_i32 : i32
    %c1_i32_9 = arith.constant 1 : i32
    scf.for %arg6 = %c0_i32_8 to %4 step %c1_i32_9  : i32 {
      %c1_i32_18 = arith.constant 1 : i32
      %10 = arith.muli %arg6, %c1_i32_18 : i32
      %c1_i32_19 = arith.constant 1 : i32
      %11 = arith.addi %c1_i32_19, %10 : i32
      %c0_i32_20 = arith.constant 0 : i32
      %12 = arith.addi %0, %c0_i32_20 : i32
      %13 = arith.addi %12, %11 : i32
      %14 = arith.index_cast %13 : i32 to index
      %15 = memref.load %arg1[%14] : memref<16xi32, #tpu.memory_space<smem>>
      %c1_i32_21 = arith.constant 1 : i32
      %16 = arith.subi %13, %c1_i32_21 : i32
      %17 = arith.index_cast %16 : i32 to index
      %18 = memref.load %arg1[%17] : memref<16xi32, #tpu.memory_space<smem>>
      %19 = arith.cmpi eq, %15, %18 : i32
      %20 = arith.extui %19 : i1 to i32
      %c0_i32_22 = arith.constant 0 : i32
      %21 = arith.cmpi ne, %20, %c0_i32_22 : i32
      scf.if %21 {
        %c1_i32_23 = arith.constant 1 : i32
        %22 = arith.subi %11, %c1_i32_23 : i32
        %c0_i32_24 = arith.constant 0 : i32
        %c0_i32_25 = arith.constant 0 : i32
        %23 = tpu.memref_slice %arg4[%c0_i32_7, %c0_i32_24, %c0_i32_25] : memref<1x8x128xf32, #tpu.memory_space<vmem>> -> memref<1x8x128xf32, #tpu.memory_space<vmem>>
        %24 = tpu.memref_squeeze %23 : memref<1x8x128xf32, #tpu.memory_space<vmem>> -> memref<8x128xf32, #tpu.memory_space<vmem>>
        %25 = arith.index_cast %22 : i32 to index
        %c0_26 = arith.constant 0 : index
        %26 = vector.load %24[%25, %c0_26] : memref<8x128xf32, #tpu.memory_space<vmem>>, vector<1x128xf32>
        %c0_i32_27 = arith.constant 0 : i32
        %c0_i32_28 = arith.constant 0 : i32
        %27 = tpu.memref_slice %arg4[%c0_i32_7, %c0_i32_27, %c0_i32_28] : memref<1x8x128xf32, #tpu.memory_space<vmem>> -> memref<1x8x128xf32, #tpu.memory_space<vmem>>
        %28 = tpu.memref_squeeze %27 : memref<1x8x128xf32, #tpu.memory_space<vmem>> -> memref<8x128xf32, #tpu.memory_space<vmem>>
        %29 = arith.index_cast %11 : i32 to index
        %c0_29 = arith.constant 0 : index
        %30 = vector.load %28[%29, %c0_29] : memref<8x128xf32, #tpu.memory_space<vmem>>, vector<1x128xf32>
        tpu.vector_store %28[%29, %c0_29], %26 {strides = array<i32>} : memref<8x128xf32, #tpu.memory_space<vmem>>, vector<1x128xf32>,
      } else {
      }
    }
    %c7_i32_10 = arith.constant 7 : i32
    %c0 = arith.constant 0 : index
    %c0_11 = arith.constant 0 : index
    %c0_12 = arith.constant 0 : index
    %5 = vector.load %arg4[%c0, %c0_11, %c0_12] : memref<1x8x128xf32, #tpu.memory_space<vmem>>, vector<1x8x128xf32>
    %c0_13 = arith.constant 0 : index
    %c0_14 = arith.constant 0 : index
    %6 = vector.load %arg3[%c0_13, %c0_14] : memref<8x128xf32, #tpu.memory_space<vmem>>, vector<8x128xf32>
    %7 = vector.shape_cast %6 : vector<8x128xf32> to vector<1x8x128xf32>
    %8 = arith.addf %5, %7 : vector<1x8x128xf32>
    %c0_15 = arith.constant 0 : index
    %c0_16 = arith.constant 0 : index
    %c0_17 = arith.constant 0 : index
    %9 = vector.load %arg4[%c0_15, %c0_16, %c0_17] : memref<1x8x128xf32, #tpu.memory_space<vmem>>, vector<1x8x128xf32>
    tpu.vector_store %arg4[%c0_15, %c0_16, %c0_17], %8 {strides = array<i32>} : memref<1x8x128xf32, #tpu.memory_space<vmem>>, vector<1x8x128xf32>,
    return
  }
  func.func @transform_1(%arg0: i32, %arg1: memref<16xi32, #tpu.memory_space<smem>>) -> (i32, i32) {
    %c0_i32 = arith.constant 0 : i32
    %c0_i32_0 = arith.constant 0 : i32
    %c0_i32_1 = arith.constant 0 : i32
    return %c0_i32, %c0_i32_0 : i32, i32
  }
  func.func @transform_2(%arg0: i32, %arg1: memref<16xi32, #tpu.memory_space<smem>>) -> (i32, i32, i32) {
    %c0_i32 = arith.constant 0 : i32
    %c0_i32_0 = arith.constant 0 : i32
    %c0_i32_1 = arith.constant 0 : i32
    return %arg0, %c0_i32, %c0_i32_0 : i32, i32, i32
  }
}

</mosaic_0001>

<bundles_post_ra>
// kernel: tpu_custom_call.1
= control target key start
LH: loop header
LB: loop body
LE: loop exit
PB: predicated region body
PF: predicated region fallthrough
CT: control target
= control target key end

     0   :  { %s893_s0 = inlined_call_operand.hbm [shape: s32[16], index: 0, kind: input, shape index: {}]   ;;  %s894_s1 = inlined_call_operand.hbm [shape: f32[512,128], index: 1, kind: input, shape index: {}]   ;;  %s895_s2 = inlined_call_operand.hbm [shape: f32[8,128], index: 2, kind: input, shape index: {}]   ;;  %s896_s3 = inlined_call_operand.hbm [shape: f32[2,8,128], index: 3, kind: output, shape index: {}]  }
   0x1   :  { %s482_s14 = scalar_lea.hbm %s893_s0, 16 }
   0x2   :  { %p483_p0 = scmp.ne.s32.totalorder %s893_s0, %s482_s14  ;;  %p486_p1 = scmp.lt.u32.totalorder %s482_s14, %s893_s0 }
   0x4   :  { %p488_p2 = pnand %p486_p1, %p483_p0 }
   0x6   :  { %491 = shalt.err (!%p488_p2)  }
   0x7   :  { %s658_s19 = smov [#allocation4]  }
   0x8   :  { %9 = dma.hbm_to_smem %s893_s0, 16, %s658_s19, [#allocation3] }
   0x9   :  { %608 = dma.done.wait [#allocation3], 16 }
   0xa   :  { %609 = vsyncadd [#allocation3], 4294967280 }
   0xb   :  { %11 = sfence }
   0xc   :  { %12 = vsyncpa [#allocation6], 0 }
   0xd   :  { %13 = vsyncpa [#allocation7], 0 }
   0xe   :  { %15 = vsyncpa [#allocation7 + $0x1], 0  ;;  %s693_s22 = smov 0   ;;  %s695_s23 = smov 0  }
   0xf   :  { %s697_s24 = smov 0   ;;  %s699_s25 = smov 0  }
  0x10 LB: > { %s714_s0 = sadd.s32 4294967295, %s640_s25   ;;  %s365_s26 = sadd.s32 4294967294, %s640_s25   ;;  %s640_s25 = sphi %s699_s25, %s914_s25   ;;  %s636_s24 = sphi %s697_s24, %s913_s24   ;;  %s632_s23 = sphi %s695_s23, %s912_s23   ;;  %s628_s22 = sphi %s693_s22, %s911_s22  }
  0x11   : > { %s718_s27 = sadd.s32 1, %s640_s25   ;;  %s49_s28 = sadd.s32 1, %s636_s24 }
  0x12   : > { %s46_s29 = ssub.s32 %s640_s25, %s718_s27  ;;  %p59_p3 = scmp.ne.s32.totalorder %s636_s24, %s632_s23 }
  0x13   : > { %p47_p4 = scmp.eq.s32.totalorder %s46_s29, 0  ;;  %p60_p5 = scmp.eq.s32.totalorder %s714_s0, 1 }
  0x14   : > { %p65_p6 = scmp.ne.s32.totalorder %s632_s23, %s628_s22  ;;  %p66_p7 = scmp.eq.s32.totalorder %s365_s26, 1 }
  0x15   : > { %s729_s30 = scalar_select %p47_p4, %s636_s24, %s49_s28  }
  0x16   : > { %p731_p8 = por %p60_p5, %p59_p3  ;;  %p735_p9 = por %p66_p7, %p65_p6 }
  0x17   : > { %p366_p10 = scmp.ge.s32.totalorder %s640_s25, 1  ;;  %p73_p11 = scmp.lt.s32.totalorder %s640_s25, 3 }
  0x18   : > { %s900_s4 = scalar_select %p731_p8, 1, 0 }
  0x19   : > { %s901_s5 = scalar_select %p735_p9, 1, 0 }
  0x1a   : > { %p897_p12 = scmp.eq.s32.totalorder %s714_s0, 0  ;;  %p742_p13 = pnand %p366_p10, %p73_p11 }
  0x1b   : > { %s659_s7 = smov [#allocation5]   ;;  %s492_s12 = scalar_lea.hbm %s895_s2, 128 }
  0x1c   : > { %s902_s6 = scalar_select %p742_p13, 1, 0 }
  0x1d   : > { %s86_s8 = sshll.u32 %s659_s7, 4  ;;  %p404_p0 = pneg %p742_p13  ;;  %s87_s8 = int_to_ptr.vmem [resolvable:$true] %s86_s8 }
  0x1e   : > { %p493_p2 = scmp.ne.s32.totalorder %s895_s2, %s492_s12  ;;  %p499_p6 = scmp.lt.u32.totalorder %s492_s12, %s895_s2 }
  0x1f   : > { %p750_p1 = pnand %p897_p12, %p404_p0 }
  0x21   : > { %p494_p3 = pneg %p750_p1 }
  0x23   : > { %p495_p4 = pnand %p494_p3, %p493_p2 }
  0x25   : > { %p496_p5 = pneg %p495_p4 }
  0x27   : > { %p501_p7 = pnand %p499_p6, %p496_p5 }
  0x29   : > { %504 = shalt.err (!%p501_p7)
}
  0x2a   : > { %s505_s17 = scalar_lea.vmem %s87_s8, 128  ;;  %p513_p12 = scmp.lt.s32.totalorder %s87_s8, %s87_s8 }
  0x2b   : > { %p506_p10 = scmp.ne.s32.totalorder %s87_s8, %s505_s17  ;;  %p514_p9 = scmp.lt.s32.totalorder %s505_s17, %s505_s17 }
  0x2d   : > { %p508_p11 = pnand %p506_p10, %p494_p3  ;;  %p515_p8 = por %p514_p9, %p513_p12 }
  0x2f   : > { %p509_p0 = pneg %p508_p11 }
  0x31   : > { %p516_p13 = pnand %p515_p8, %p509_p0 }
  0x33   : > { %519 = shalt.err (!%p516_p13)
}
  0x34   : > { %407 = dma.hbm_to_vmem [thread:$0]  (!%p750_p1), %s895_s2, 128, %s87_s8, [#allocation6]  }
  0x35   : > { %p904_p2 = scmp.ne.s32.totalorder %s902_s6, 0 }
  0x36   : > { %p905_p4 = scmp.eq.s32.totalorder (!%p904_p2), %s714_s0, 0 }
  0x37   : > { %99 = sbr.rel (%p904_p2) target bundleno = 175 (0xaf), region = 24 }
  0x3e   : > { %611 = dma.done.wait (%p905_p4), [#allocation6], 128   ;;  %p906_p3 = pmov %p905_p4 }
  0x3f   : > { %s111_s20 = sand.u32 1, %s632_s23   ;;  %s371_s21 = sshll.u32 %s714_s0, 3 }
  0x40   : > { %613 = vsyncadd (%p906_p3), [#allocation6], 4294967168  ;;  %s370_s26 = sshll.u32 %s111_s20, 3  ;;  %s782_s29 = smov 0  }
  0x41   : > { %s780_s28 = scalar_lea.vmem [#allocation8], %s370_s26  ;;  %s784_s7 = smov 0  }
  0x42 LB: >> { %s122_s6 = sadd.s32 %s648_s7, %s371_s21  ;;  %p133_p9 = scmp.lt.s32.totalorder %s644_s29, 0  ;;  %s648_s7 = sphi %s784_s7, %s120_s7   ;;  %s644_s29 = sphi %s782_s29, %s908_s29  }
  0x43   : >> { %s372_s8 = sadd.s32 4294967295, %s122_s6  ;;  %s123_s9 = sld [smem:[#allocation4 + %s122_s6]] }
  0x44   : >> { %p125_p8 = scmp.gt.s32.totalorder %s372_s8, 0  ;;  %s134_s10 = ssub.s32 0, %s644_s29 }
  0x45   : >> { %s373_s11 = smin.u32 %s644_s29, %s134_s10  ;;  %p128_p12 = scmp.gt.s32.totalorder %s648_s7, 0 }
  0x46   : >> { %s916_s8 = smov (!%p125_p8, %s372_s8), 0  ;;  %s136_s13 = sand.u32 7, %s373_s11  }
  0x47   : >> { %s127_s12 = sld [smem:[#allocation4 + %s916_s8]]  ;;  %s137_s14 = ssub.s32 0, %s136_s13 }
  0x48   : >> { %s918_s14 = smov (!%p133_p9, %s137_s14), %s136_s13  ;;  %p145_p5 = scmp.ge.s32.totalorder %s644_s29, 8 }
  0x49   : >> { %p375_p13 = scmp.lt.s32.totalorder %s918_s14, 0  ;;  %s143_s15 = sadd.s32 8, %s918_s14 }
  0x4b   : >> { %s920_s15 = smov (!%p375_p13, %s143_s15), %s918_s14 }
  0x4c   : >> { %s806_s17 = scalar_lea.sflag [#allocation2], %s920_s15 }
  0x4d   : >> { %p129_p1 = scmp.eq.s32.totalorder %s123_s9, %s127_s12 }
  0x4f   : >> { %p800_p6 = pnand %p129_p1, %p128_p12 }
  0x51   : >> { %p146_p7 = pnand %p145_p5, %p800_p6 }
  0x53   : >> { %615 = dma.done.wait (!%p146_p7), %s806_s17, 16 }
  0x54   : >> { %617 = vsyncadd (!%p146_p7), %s806_s17, 4294967280  ;;  %s376_s18 = sshll.u32 %s123_s9, 4  ;;  %s158_s19 = scalar_lea.vmem %s780_s28, %s648_s7 [#allocation8] }
  0x55   : >> { %s815_s8 = scalar_lea.hbm %s894_s1, %s376_s18  ;;  %s167_s10 = sshll.u32 %s158_s19, 4  ;;  %s168_s10 = int_to_ptr.vmem [resolvable:$true] %s167_s10 }
  0x56   : >> { %s520_s11 = scalar_lea.hbm %s815_s8, 16  ;;  %s524_s9 = scalar_lea.hbm %s894_s1, 8192 }
  0x57   : >> { %p521_p10 = scmp.ne.s32.totalorder %s815_s8, %s520_s11  ;;  %p525_p2 = scmp.lt.u32.totalorder %s815_s8, %s894_s1 }
  0x58   : >> { %p526_p4 = scmp.lt.u32.totalorder %s524_s9, %s520_s11  ;;  %p528_p8 = scmp.lt.u32.totalorder %s520_s11, %s815_s8 }
  0x59   : >> { %p522_p11 = pnand %p521_p10, %p800_p6 }
  0x5a   : >> { %p527_p3 = por %p526_p4, %p525_p2 }
  0x5b   : >> { %p523_p0 = pneg %p522_p11 }
  0x5c   : >> { %p529_p9 = por %p528_p8, %p527_p3 }
  0x5e   : >> { %p530_p12 = pnand %p529_p9, %p523_p0 }
  0x60   : >> { %533 = shalt.err (!%p530_p12)  }
  0x61   : >> { %s534_s18 = scalar_lea.vmem %s168_s10, 16  ;;  %s660_s19 = smov [#allocation8]  }
  0x62   : >> { %p535_p13 = scmp.ne.s32.totalorder %s168_s10, %s534_s18  ;;  %s538_s26 = sshll.u32 %s660_s19, 4  ;;  %s831_s26 = int_to_ptr.vmem [resolvable:$false] %s538_s26 }
  0x63   : >> { %s540_s6 = scalar_lea.vmem %s831_s26, 256  ;;  %p541_p7 = scmp.lt.s32.totalorder %s168_s10, %s831_s26 }
  0x64   : >> { %p536_p1 = pnand %p535_p13, %p800_p6  ;;  %p542_p10 = scmp.lt.s32.totalorder %s540_s6, %s534_s18 }
  0x66   : >> { %p537_p5 = pneg %p536_p1  ;;  %p543_p11 = por %p542_p10, %p541_p7 }
  0x68   : >> { %p544_p0 = pnand %p543_p11, %p537_p5 }
  0x6a   : >> { %547 = shalt.err (!%p544_p0)  }
  0x6b   : >> { %399 = dma.hbm_to_vmem [thread:$0]  (%p800_p6), %s815_s8, 16, %s168_s10, %s806_s17 }
  0x6c   : >> { %s171_s11 = scalar_select %p800_p6, 1, 0 }
  0x6d   : >> { %s120_s7 = sadd.s32 1, %s648_s7  }
  0x6e   : >> { %s172_s12 = sadd.s32 %s644_s29, %s171_s11   ;;  %p117_p2 = scmp.ge.s32.totalorder %s120_s7, 8  }
  0x6f   : >> { %s908_s29 = smov %s172_s12  ;;  %s650_s13 = smov (%p117_p2), 0  }
  0x70   : > { %119 = sbr.rel (!%p117_p2) target bundleno = 66 (0x42), region = 116 }
  0x77 LB: >> { %p414_p4 = scmp.lt.s32.totalorder %s652_s13, %s172_s12  ;;  %s183_s9 = scalar_lea.sflag [#allocation2], %s652_s13  ;;  %s652_s13 = sphi %s650_s13, %s178_s13  }
  0x79   : >> { %619 = dma.done.wait (%p414_p4), %s183_s9, 16 }
  0x7a   : >> { %621 = vsyncadd (%p414_p4), %s183_s9, 4294967280  ;;  %s178_s13 = sadd.s32 1, %s652_s13  }
  0x7b   : >> { %p175_p3 = scmp.ge.s32.totalorder %s178_s13, 8  }
  0x7c   : > { %s654_s16 = smov (%p175_p3), 0  }
  0x7d   : > { %177 = sbr.rel (!%p175_p3) target bundleno = 119 (0x77), region = 127 }
  0x84 LB: >> { %s193_s17 = sadd.s32 1, %s656_s16   ;;  %s656_s16 = sphi %s654_s16, %s655_s16  }
  0x85   : >> { %s194_s7 = sadd.s32 %s371_s21, %s193_s17 }
  0x86   : >> { %s195_s29 = sld [smem:[#allocation4 + %s194_s7]]  ;;  %s378_s8 = sadd.s32 4294967295, %s194_s7 }
  0x87   : >> { %s197_s10 = sld [smem:[#allocation4 + %s378_s8]] }
  0x8d   : >> { %p379_p6 = scmp.ne.s32.totalorder %s195_s29, %s197_s10 }
  0x8e   : >> { %s202_s14 = scalar_lea.vmem (!%p379_p6), %s780_s28, %s656_s16 [#allocation8] }
  0x8f   : >> { %201 = sbr.rel (%p379_p6) target bundleno = 150 (0x96), region = 69  ;;  %v203_v0 = vld [vmem:[%s202_s14] sm:$0x1] (!%p379_p6) }
  0x90   : >> { %380 = vst [vmem:[%s202_s14 + $0x1] sm:$0x1] (!%p379_p6), %v203_v0 }
  0x96 PF: >> { %p189_p8 = scmp.ge.s32.totalorder %s193_s17, 7   ;;  %s655_s16 = smov %s193_s17  }
  0x97   : > { %v206_v1 = vld [vmem:[%s780_s28] sm:$0xff] (%p189_p8)  ;;  %v207_v2 = vld [vmem:[#allocation5] sm:$0xff] (%p189_p8)  ;;  %s382_s15 = sshll.u32 (%p189_p8), %s714_s0, 7  ;;  %s224_s12 = sshll.u32 (%p189_p8), %s780_s28, 4  ;;  %s225_s12 = int_to_ptr.vmem [resolvable:$true] %s224_s12 }
  0x98   : > { %191 = sbr.rel (!%p189_p8) target bundleno = 132 (0x84), region = 138  ;;  %v208_v3 = vadd.f32 (%p189_p8), %v207_v2, %v206_v1  ;;  %s222_s11 = scalar_lea.hbm (%p189_p8), %s896_s3, %s382_s15 }
  0x99   : > { %s211_s21 = scalar_lea.sflag (%p189_p8), [#allocation7], %s111_s20  ;;  %s548_s13 = scalar_lea.vmem (%p189_p8), %s225_s12, 128 }
  0x9a   : > { %209 = vst [vmem:[%s780_s28] sm:$0xff] (%p189_p8), %v208_v3  ;;  %p549_p9 = scmp.ne.s32.totalorder (%p189_p8), %s225_s12, %s548_s13  ;;  %p909_p12 = scmp.ne.s32.totalorder (%p189_p8), %s900_s4, 0 }
  0x9b   : > { %p555_p5 = scmp.lt.s32.totalorder (%p189_p8), %s225_s12, %s831_s26  ;;  %p556_p7 = scmp.lt.s32.totalorder (%p189_p8), %s540_s6, %s548_s13 }
  0x9c   : > { %p550_p13 = pnand (%p189_p8), %p549_p9, %p909_p12 }
  0x9d   : > { %p557_p10 = por (%p189_p8), %p556_p7, %p555_p5 }
  0x9e   : > { %p551_p1 = pneg (%p189_p8), %p550_p13 }
  0xa0   : > { %p558_p11 = pnand %p557_p10, %p551_p1 }
  0xa2   : > { %561 = shalt.err (!%p558_p11)
}
  0xa3   : > { %s562_s0 = scalar_lea.hbm %s222_s11, 128  ;;  %s566_s20 = scalar_lea.hbm %s896_s3, 256 }
  0xa4   : > { %p563_p0 = scmp.ne.s32.totalorder %s222_s11, %s562_s0  ;;  %p567_p3 = scmp.lt.u32.totalorder %s222_s11, %s896_s3 }
  0xa5   : > { %p568_p6 = scmp.lt.u32.totalorder %s566_s20, %s562_s0  ;;  %p570_p9 = scmp.lt.u32.totalorder %s562_s0, %s222_s11 }
  0xa6   : > { %p564_p2 = pnand %p563_p0, %p909_p12 }
  0xa7   : > { %p569_p8 = por %p568_p6, %p567_p3 }
  0xa8   : > { %p565_p4 = pneg %p564_p2 }
  0xa9   : > { %p571_p13 = por %p570_p9, %p569_p8 }
  0xab   : > { %p572_p1 = pnand %p571_p13, %p565_p4 }
  0xad   : > { %575 = shalt.err (!%p572_p1)
}
  0xae   : > { %402 = dma.vmem_to_hbm [thread:$0]  (%p909_p12), %s225_s12, 128, %s222_s11, %s211_s21  }
  0xaf PF: > { %p415_p5 = scmp.ge.s32.totalorder %s640_s25, 2  ;;  %s236_s26 = sand.u32 1, %s628_s22  }
  0xb0   : > { %p910_p7 = scmp.ne.s32.totalorder %s901_s5, 0  ;;  %s237_s6 = scalar_lea.sflag [#allocation7], %s236_s26 }
  0xb2   : > { %p409_p10 = pnand %p415_p5, %p910_p7 }
  0xb4   : > { %623 = dma.done.wait (!%p409_p10), %s237_s6, 128  }
  0xb5   : > { %625 = vsyncadd (!%p409_p10), %s237_s6, 4294967168  ;;  %p18_p11 = scmp.ge.s32.totalorder %s718_s27, 4   ;;  %s911_s22 = smov %s632_s23 }
  0xb6   : > { %s912_s23 = smov %s636_s24  ;;  %s913_s24 = smov %s729_s30 }
  0xb7   : > { %s914_s25 = smov %s718_s27  ;;  %20 = sbr.rel (!%p18_p11) target bundleno = 16 (0x10), region = 149 }
  0xbe   :  { %242 = vsyncpa [#allocation6], 1 }
  0xbf   :  { %244 = vsyncpa [#allocation6 + $0x1], 1 }
  0xc0   :  { %245 = vsyncpa [#allocation7], 1 }
  0xc1   :  { %247 = vsyncpa [#allocation7 + $0x1], 1 }
  0xc2   :  { %248 = vsyncmov [#allocation2] }
  0xc5   :  { %s249_s25 = vpop.sfrf %248 }
  0xc6   :  { %p385_p12 = scmp.ne.s32.totalorder %s249_s25, 0 }
  0xc8   :  { %253 = shalt.err (%p385_p12)  }
  0xc9   :  { %255 = vsyncmov [#allocation2 + $0x1] }
  0xcc   :  { %s256_s4 = vpop.sfrf %255 }
  0xcd   :  { %p386_p0 = scmp.ne.s32.totalorder %s256_s4, 0 }
  0xcf   :  { %260 = shalt.err (%p386_p0)  }
  0xd0   :  { %262 = vsyncmov [#allocation2 + $0x2] }
  0xd3   :  { %s263_s5 = vpop.sfrf %262 }
  0xd4   :  { %p387_p2 = scmp.ne.s32.totalorder %s263_s5, 0 }
  0xd6   :  { %267 = shalt.err (%p387_p2)  }
  0xd7   :  { %269 = vsyncmov [#allocation2 + $0x3] }
  0xda   :  { %s270_s30 = vpop.sfrf %269 }
  0xdb   :  { %p388_p4 = scmp.ne.s32.totalorder %s270_s30, 0 }
  0xdd   :  { %274 = shalt.err (%p388_p4)  }
  0xde   :  { %276 = vsyncmov [#allocation2 + $0x4] }
  0xe1   :  { %s277_s1 = vpop.sfrf %276 }
  0xe2   :  { %p389_p3 = scmp.ne.s32.totalorder %s277_s1, 0 }
  0xe4   :  { %281 = shalt.err (%p389_p3)  }
  0xe5   :  { %283 = vsyncmov [#allocation2 + $0x5] }
  0xe8   :  { %s284_s2 = vpop.sfrf %283 }
  0xe9   :  { %p390_p6 = scmp.ne.s32.totalorder %s284_s2, 0 }
  0xeb   :  { %288 = shalt.err (%p390_p6)  }
  0xec   :  { %290 = vsyncmov [#allocation2 + $0x6] }
  0xef   :  { %s291_s3 = vpop.sfrf %290 }
  0xf0   :  { %p391_p8 = scmp.ne.s32.totalorder %s291_s3, 0 }
  0xf2   :  { %295 = shalt.err (%p391_p8)  }
  0xf3   :  { %297 = vsyncmov [#allocation2 + $0x7] }
  0xf6   :  { %s298_s22 = vpop.sfrf %297 }
  0xf7   :  { %p392_p9 = scmp.ne.s32.totalorder %s298_s22, 0 }
  0xf9   :  { %302 = shalt.err (%p392_p9)  }

</bundles_post_ra>
